<compile_context>
chip_gen: v6e
topology: v6e:2x2x1
jax: 0.10.0
libtpu: 0.0.40
codegen_flags: <defaults>
</compile_context>

<pallas_src>
import functools

import jax
import jax.numpy as jnp
from jax.experimental import pallas as pl
from jax.experimental.pallas import tpu as pltpu


def _memory_kernel(S,
                   w_ref, utt_ref, wr_ref,
                   pre_mem_ref, pre_mem_flat_ref,
                   w_cat_ref, b_cat_ref,
                   r_sel_ref, sel2_ref,
                   mem_ref, read_ref):
    utt = utt_ref[...]                                             # (tB, E)

    # One fused MXU matmul for both gate pre-activations; column order [a | e].
    ea = jnp.dot(utt, w_cat_ref[...],
                 preferred_element_type=jnp.float32) + b_cat_ref[...]   # (tB, 2S)
    # tanh on the `a` half, sigmoid on the `e` half via a lane select (avoids a
    # lane re-concatenation before the expansion matmul).  Evaluating both
    # transcendentals on 2S lanes is negligible EUP work.
    lane = jax.lax.broadcasted_iota(jnp.int32, ea.shape, 1)
    gates = jnp.where(lane < S, jnp.tanh(ea), jax.nn.sigmoid(ea))  # (tB,2S)=[a_f|e_f]
    a_f = gates[:, :S]                                             # (tB, S)
    e_f = gates[:, S:]                                             # (tB, S)

    w = w_ref[...]                                                 # (tB, M)

    # Lane-dense expansion to (tB, M*S) with TWO selection-matrix matmuls
    # (pre_mem is folded into sel2 in the wrapper):
    #   w_rep[b, m*S+s] = w[b, m]
    #   g_rep[b, m*S+s] = a_f[b, s] - e_f[b, s] * pre_mem[m, s]
    w_rep = jnp.dot(w, r_sel_ref[...], preferred_element_type=jnp.float32)
    g_rep = jnp.dot(gates, sel2_ref[...], preferred_element_type=jnp.float32)

    # mem[b,m,s] = pre_mem[m,s]*(1 - w[b,m]*e_f[b,s]) + w[b,m]*a_f[b,s]
    #            = pre_mem[m,s] + w[b,m] * (a_f[b,s] - e_f[b,s]*pre_mem[m,s])
    mem_ref[...] = (pre_mem_flat_ref[...] + w_rep * g_rep).astype(mem_ref.dtype)

    # read[b,s] = sum_m wr[b,m] * mem[b,m,s]
    #           = (wr @ P)[b,s] - e_f[b,s]*((wr*w) @ P)[b,s]
    #             + a_f[b,s]*sum_m(wr*w)[b,m]
    wr = wr_ref[...]                                               # (tB, M)
    wrw = wr * w                                                   # (tB, M)
    pm = pre_mem_ref[...]                                          # (M, S)
    t1 = jnp.dot(wr, pm, preferred_element_type=jnp.float32)       # (tB, S)
    t2 = jnp.dot(wrw, pm, preferred_element_type=jnp.float32)      # (tB, S)
    t3 = jnp.sum(wrw, axis=1, keepdims=True)                       # (tB, 1)
    # NOTE: t1/t2 could be fused into one dot via a sublane concat; review rated
    # it marginal (only if the bundle shows vmatmul/pop pressure), so keep both.
    read_ref[...] = (t1 - e_f * t2 + a_f * t3).astype(read_ref.dtype)


def _choose_block_b(B, block_b):
    """Pick the batch-tile size.

    Prefer >= 2 tiles (even count) so the double-buffered pipeline overlaps the
    dominant (bb, M*S) writeback with compute and both v7x TensorCores get an
    equal share under dimension_semantics=("parallel",).  Fall back to a single
    full-batch tile only when B is too small to split at 8-row granularity.
    """
    if B < 16:
        return B
    n_tiles = max(2, pl.cdiv(B, block_b))
    if n_tiles % 2:
        n_tiles += 1                      # even tile count -> balanced TC split
    bb = 8 * pl.cdiv(B, 8 * n_tiles)
    return max(8, min(bb, block_b))


def memory_module_forward(w_corr, utt_emb, pre_mem, params, wr_corr=None,
                          *, block_b=512, mem_dtype=jnp.float32):
    """Pallas wrapper mirroring MemoryModule.forward.

    Returns (mem, read_content) with mem:(B,M,S), read_content:(B,S).
    Set mem_dtype=jnp.bfloat16 to halve the dominant HBM writeback (arithmetic
    stays f32); the default keeps the PyTorch module's f32 output semantics.
    """
    B, M = w_corr.shape
    _, E = utt_emb.shape
    S = pre_mem.shape[1]
    if wr_corr is None:
        wr_corr = w_corr

    # Fuse the two linears (a_conn | e_conn) into one (E, 2S) weight / bias,
    # column order [a | e] to match the in-kernel lane select.
    w_cat = jnp.concatenate([params["wa"], params["we"]], axis=1)   # (E, 2S)
    b_cat = jnp.concatenate([params["ba"], params["be"]], axis=1)   # (1, 2S)

    pre_mem_flat = pre_mem.reshape(1, M * S)

    # 0/1 selection matrices used in-kernel to build lane-dense (tB, M*S)
    # operands on the MXU (avoids a (B,M)->(B,M,S) cross-lane relayout).
    idx = jnp.arange(M * S)
    r_sel = (idx[None, :] // S == jnp.arange(M)[:, None]).astype(jnp.float32)  # (M, M*S)
    t_sel = (idx[None, :] % S == jnp.arange(S)[:, None]).astype(jnp.float32)   # (S, M*S)
    # Fold pre_mem into the state selector so the erase+add expansion is ONE
    # matmul:  [a_f | e_f] @ sel2  ->  a_f[b,s] - e_f[b,s]*pre_mem[m,s].
    sel2 = jnp.concatenate([t_sel, -(t_sel * pre_mem_flat)], axis=0)           # (2S, M*S)

    bb = _choose_block_b(B, block_b)
    grid = (pl.cdiv(B, bb),)

    def bspec(shape):   # batch-tiled block
        return pl.BlockSpec(shape, lambda i: (i, 0))

    def cspec(shape):   # full-array / constant-index block
        return pl.BlockSpec(shape, lambda i: (0, 0))

    mem_flat, read_content = pl.pallas_call(
        functools.partial(_memory_kernel, S),
        out_shape=(jax.ShapeDtypeStruct((B, M * S), mem_dtype),
                   jax.ShapeDtypeStruct((B, S), jnp.float32)),
        grid=grid,
        in_specs=[bspec((bb, M)),            # w_corr
                  bspec((bb, E)),            # utt_emb
                  bspec((bb, M)),            # wr_corr
                  cspec((M, S)),             # pre_mem
                  cspec((1, M * S)),         # pre_mem (flat, lane-dense)
                  cspec((E, 2 * S)),         # fused gate weights [wa | we]
                  cspec((1, 2 * S)),         # fused gate biases  [ba | be]
                  cspec((M, M * S)),         # slot-selection matrix
                  cspec((2 * S, M * S))],    # state selector with pre_mem folded
        out_specs=(bspec((bb, M * S)),       # mem (lane-dense slab)
                   bspec((bb, S))),          # read_content
        compiler_params=pltpu.CompilerParams(
            dimension_semantics=("parallel",)),
    )(w_corr, utt_emb, wr_corr, pre_mem, pre_mem_flat, w_cat, b_cat,
      r_sel, sel2)

    # Layout plumbing only: present the lane-dense slab as (B, M, S).
    mem = mem_flat.reshape(B, M, S).astype(mem_dtype)
    return mem, read_content


def init_params(key, emb_size, mem_state_size):
    """Deterministic synthetic parameters for a_conn / e_conn linears."""
    k1, k2, k3, k4 = jax.random.split(key, 4)
    scale = 1.0 / jnp.sqrt(emb_size)
    return {
        "wa": jax.random.uniform(k1, (emb_size, mem_state_size),
                                 jnp.float32, -scale, scale),
        "ba": jax.random.uniform(k2, (1, mem_state_size),
                                 jnp.float32, -scale, scale),
        "we": jax.random.uniform(k3, (emb_size, mem_state_size),
                                 jnp.float32, -scale, scale),
        "be": jax.random.uniform(k4, (1, mem_state_size),
                                 jnp.float32, -scale, scale),
    }


def _reference(w_corr, utt_emb, pre_mem, params, wr_corr):
    """Pure-JAX reference matching the PyTorch module."""
    e_f = jax.nn.sigmoid(utt_emb @ params["we"] + params["be"])
    a_f = jnp.tanh(utt_emb @ params["wa"] + params["ba"])
    mem = (pre_mem[None] * (1.0 - w_corr[:, :, None] * e_f[:, None, :])
           + w_corr[:, :, None] * a_f[:, None, :])
    read = jnp.einsum("bm,bms->bs", wr_corr, mem)
    return mem, read


if __name__ == "__main__":
    E, M, S = 32, 16, 32     # emb_size, mem_size, mem_state_size

    key = jax.random.PRNGKey(0)
    k_params, k_w, k_u, k_m, k_wr = jax.random.split(key, 5)

    params = init_params(k_params, E, S)
    pre_mem = jax.random.normal(k_m, (M, S), jnp.float32)

    # (B=2, wr given): tiny single-tile path with explicit read weights
    # (B=2, wr=None):  default branch (wr_corr falls back to w_corr)
    # (B=40, wr given): multi-tile grid (2 tiles of 24 rows, partial last tile)
    ok = True
    for B, use_wr in ((2, True), (2, False), (40, True)):
        w_corr = jax.nn.softmax(
            jax.random.normal(jax.random.fold_in(k_w, B), (B, M), jnp.float32),
            axis=-1)
        utt_emb = jax.random.normal(jax.random.fold_in(k_u, B), (B, E),
                                    jnp.float32)
        wr_corr = (jax.nn.softmax(
            jax.random.normal(jax.random.fold_in(k_wr, B), (B, M), jnp.float32),
            axis=-1) if use_wr else None)

        mem, read = memory_module_forward(w_corr, utt_emb, pre_mem, params,
                                          wr_corr=wr_corr)
        jax.block_until_ready((mem, read))

        mem_ref, read_ref = _reference(
            w_corr, utt_emb, pre_mem, params,
            wr_corr if wr_corr is not None else w_corr)
        ok &= bool(jnp.allclose(mem, mem_ref, atol=1e-5, rtol=1e-5))
        ok &= bool(jnp.allclose(read, read_ref, atol=1e-5, rtol=1e-5))

    assert ok
    print("KERNEL_OK")
</pallas_src>

<mosaic_0001>
module attributes {stable_mosaic.version = 11 : i64} {
  func.func @_memory_kernel(%arg0: i32, %arg1: memref<2x16xf32, #tpu.memory_space<vmem>>, %arg2: memref<2x32xf32, #tpu.memory_space<vmem>>, %arg3: memref<2x16xf32, #tpu.memory_space<vmem>>, %arg4: memref<16x32xf32, #tpu.memory_space<vmem>>, %arg5: memref<1x512xf32, #tpu.memory_space<vmem>>, %arg6: memref<32x64xf32, #tpu.memory_space<vmem>>, %arg7: memref<1x64xf32, #tpu.memory_space<vmem>>, %arg8: memref<16x512xf32, #tpu.memory_space<vmem>>, %arg9: memref<64x512xf32, #tpu.memory_space<vmem>>, %arg10: memref<2x512xf32, #tpu.memory_space<vmem>>, %arg11: memref<2x32xf32, #tpu.memory_space<vmem>>) attributes {dimension_semantics = [#tpu.dimension_semantics<parallel>], iteration_bounds = array<i64: 1>, scalar_prefetch = 0 : i64, scratch_operands = 0 : i64, tpu.core_type = #tpu.core_type<tc>, window_params = [{transform_indices = @transform_0, window_bounds = array<i64: 2, 16>}, {transform_indices = @transform_1, window_bounds = array<i64: 2, 32>}, {transform_indices = @transform_2, window_bounds = array<i64: 2, 16>}, {pipeline_mode = #tpu.pipeline_mode<synchronous>, transform_indices = @transform_3, window_bounds = array<i64: 16, 32>}, {pipeline_mode = #tpu.pipeline_mode<synchronous>, transform_indices = @transform_4, window_bounds = array<i64: 1, 512>}, {pipeline_mode = #tpu.pipeline_mode<synchronous>, transform_indices = @transform_5, window_bounds = array<i64: 32, 64>}, {pipeline_mode = #tpu.pipeline_mode<synchronous>, transform_indices = @transform_6, window_bounds = array<i64: 1, 64>}, {pipeline_mode = #tpu.pipeline_mode<synchronous>, transform_indices = @transform_7, window_bounds = array<i64: 16, 512>}, {pipeline_mode = #tpu.pipeline_mode<synchronous>, transform_indices = @transform_8, window_bounds = array<i64: 64, 512>}, {transform_indices = @transform_9, window_bounds = array<i64: 2, 512>}, {transform_indices = @transform_10, window_bounds = array<i64: 2, 32>}]} {
    %c0 = arith.constant 0 : index
    %c0_0 = arith.constant 0 : index
    %0 = vector.load %arg2[%c0, %c0_0] : memref<2x32xf32, #tpu.memory_space<vmem>>, vector<2x32xf32>
    %c0_1 = arith.constant 0 : index
    %c0_2 = arith.constant 0 : index
    %1 = vector.load %arg6[%c0_1, %c0_2] : memref<32x64xf32, #tpu.memory_space<vmem>>, vector<32x64xf32>
    %cst = arith.constant dense<0.000000e+00> : vector<2x64xf32>
    %2 = tpu.matmul %0, %1, %cst {dimension_numbers = #tpu.dot_dimension_numbers<[1], [0], [0], [1], [0, 0, 1, 1], [], []>} : vector<2x32xf32>, vector<32x64xf32>, vector<2x64xf32> -> vector<2x64xf32>
    %c0_3 = arith.constant 0 : index
    %c0_4 = arith.constant 0 : index
    %3 = vector.load %arg7[%c0_3, %c0_4] : memref<1x64xf32, #tpu.memory_space<vmem>>, vector<1x64xf32>
    %4 = vector.broadcast %3 : vector<1x64xf32> to vector<2x64xf32>
    %5 = arith.addf %2, %4 : vector<2x64xf32>
    %6 = tpu.iota {dimensions = array<i32: 1>} : vector<2x64xi32>
    %c32_i32 = arith.constant 32 : i32
    %7 = vector.broadcast %c32_i32 : i32 to vector<2x64xi32>
    %8 = arith.cmpi slt, %6, %7 : vector<2x64xi32>
    %9 = math.tanh %5 : vector<2x64xf32>
    %10 = arith.negf %5 : vector<2x64xf32>
    %11 = math.exp %10 : vector<2x64xf32>
    %cst_5 = arith.constant 1.000000e+00 : f32
    %12 = vector.broadcast %cst_5 : f32 to vector<2x64xf32>
    %13 = arith.addf %12, %11 : vector<2x64xf32>
    %14 = arith.divf %12, %13 : vector<2x64xf32>
    %15 = arith.select %8, %9, %14 : vector<2x64xi1>, vector<2x64xf32>
    %16 = vector.extract_strided_slice %15 {offsets = [0, 0], sizes = [2, 32], strides = [1, 1]} : vector<2x64xf32> to vector<2x32xf32>
    %17 = vector.extract_strided_slice %15 {offsets = [0, 32], sizes = [2, 32], strides = [1, 1]} : vector<2x64xf32> to vector<2x32xf32>
    %c0_6 = arith.constant 0 : index
    %c0_7 = arith.constant 0 : index
    %18 = vector.load %arg1[%c0_6, %c0_7] : memref<2x16xf32, #tpu.memory_space<vmem>>, vector<2x16xf32>
    %c0_8 = arith.constant 0 : index
    %c0_9 = arith.constant 0 : index
    %19 = vector.load %arg8[%c0_8, %c0_9] : memref<16x512xf32, #tpu.memory_space<vmem>>, vector<16x512xf32>
    %cst_10 = arith.constant dense<0.000000e+00> : vector<2x512xf32>
    %20 = tpu.matmul %18, %19, %cst_10 {dimension_numbers = #tpu.dot_dimension_numbers<[1], [0], [0], [1], [0, 0, 1, 1], [], []>} : vector<2x16xf32>, vector<16x512xf32>, vector<2x512xf32> -> vector<2x512xf32>
    %c0_11 = arith.constant 0 : index
    %c0_12 = arith.constant 0 : index
    %21 = vector.load %arg9[%c0_11, %c0_12] : memref<64x512xf32, #tpu.memory_space<vmem>>, vector<64x512xf32>
    %cst_13 = arith.constant dense<0.000000e+00> : vector<2x512xf32>
    %22 = tpu.matmul %15, %21, %cst_13 {dimension_numbers = #tpu.dot_dimension_numbers<[1], [0], [0], [1], [0, 0, 1, 1], [], []>} : vector<2x64xf32>, vector<64x512xf32>, vector<2x512xf32> -> vector<2x512xf32>
    %c0_14 = arith.constant 0 : index
    %c0_15 = arith.constant 0 : index
    %23 = vector.load %arg5[%c0_14, %c0_15] : memref<1x512xf32, #tpu.memory_space<vmem>>, vector<1x512xf32>
    %24 = arith.mulf %20, %22 : vector<2x512xf32>
    %25 = vector.broadcast %23 : vector<1x512xf32> to vector<2x512xf32>
    %26 = arith.addf %25, %24 : vector<2x512xf32>
    %c0_16 = arith.constant 0 : index
    %c0_17 = arith.constant 0 : index
    %27 = vector.load %arg10[%c0_16, %c0_17] : memref<2x512xf32, #tpu.memory_space<vmem>>, vector<2x512xf32>
    tpu.vector_store %arg10[%c0_16, %c0_17], %26 {strides = array<i32>} : memref<2x512xf32, #tpu.memory_space<vmem>>, vector<2x512xf32>,
    %c0_18 = arith.constant 0 : index
    %c0_19 = arith.constant 0 : index
    %28 = vector.load %arg3[%c0_18, %c0_19] : memref<2x16xf32, #tpu.memory_space<vmem>>, vector<2x16xf32>
    %29 = arith.mulf %28, %18 : vector<2x16xf32>
    %c0_20 = arith.constant 0 : index
    %c0_21 = arith.constant 0 : index
    %30 = vector.load %arg4[%c0_20, %c0_21] : memref<16x32xf32, #tpu.memory_space<vmem>>, vector<16x32xf32>
    %cst_22 = arith.constant dense<0.000000e+00> : vector<2x32xf32>
    %31 = tpu.matmul %28, %30, %cst_22 {dimension_numbers = #tpu.dot_dimension_numbers<[1], [0], [0], [1], [0, 0, 1, 1], [], []>} : vector<2x16xf32>, vector<16x32xf32>, vector<2x32xf32> -> vector<2x32xf32>
    %cst_23 = arith.constant dense<0.000000e+00> : vector<2x32xf32>
    %32 = tpu.matmul %29, %30, %cst_23 {dimension_numbers = #tpu.dot_dimension_numbers<[1], [0], [0], [1], [0, 0, 1, 1], [], []>} : vector<2x16xf32>, vector<16x32xf32>, vector<2x32xf32> -> vector<2x32xf32>
    %cst_24 = arith.constant dense<0.000000e+00> : vector<2xf32>
    %33 = vector.multi_reduction <add>, %29, %cst_24 [1] : vector<2x16xf32> to vector<2xf32>
    %34 = vector.shape_cast %33 : vector<2xf32> to vector<2x1xf32>
    %35 = arith.mulf %17, %32 : vector<2x32xf32>
    %36 = arith.subf %31, %35 : vector<2x32xf32>
    %37 = vector.broadcast %34 : vector<2x1xf32> to vector<2x32xf32>
    %38 = arith.mulf %16, %37 : vector<2x32xf32>
    %39 = arith.addf %36, %38 : vector<2x32xf32>
    %c0_25 = arith.constant 0 : index
    %c0_26 = arith.constant 0 : index
    %40 = vector.load %arg11[%c0_25, %c0_26] : memref<2x32xf32, #tpu.memory_space<vmem>>, vector<2x32xf32>
    tpu.vector_store %arg11[%c0_25, %c0_26], %39 {strides = array<i32>} : memref<2x32xf32, #tpu.memory_space<vmem>>, vector<2x32xf32>,
    return
  }
  func.func @transform_0(%arg0: i32) -> (i32, i32) {
    %c0_i32 = arith.constant 0 : i32
    %c0_i32_0 = arith.constant 0 : i32
    return %arg0, %c0_i32 : i32, i32
  }
  func.func @transform_1(%arg0: i32) -> (i32, i32) {
    %c0_i32 = arith.constant 0 : i32
    %c0_i32_0 = arith.constant 0 : i32
    return %arg0, %c0_i32 : i32, i32
  }
  func.func @transform_2(%arg0: i32) -> (i32, i32) {
    %c0_i32 = arith.constant 0 : i32
    %c0_i32_0 = arith.constant 0 : i32
    return %arg0, %c0_i32 : i32, i32
  }
  func.func @transform_3(%arg0: i32) -> (i32, i32) {
    %c0_i32 = arith.constant 0 : i32
    %c0_i32_0 = arith.constant 0 : i32
    %c0_i32_1 = arith.constant 0 : i32
    return %c0_i32, %c0_i32_0 : i32, i32
  }
  func.func @transform_4(%arg0: i32) -> (i32, i32) {
    %c0_i32 = arith.constant 0 : i32
    %c0_i32_0 = arith.constant 0 : i32
    %c0_i32_1 = arith.constant 0 : i32
    return %c0_i32, %c0_i32_0 : i32, i32
  }
  func.func @transform_5(%arg0: i32) -> (i32, i32) {
    %c0_i32 = arith.constant 0 : i32
    %c0_i32_0 = arith.constant 0 : i32
    %c0_i32_1 = arith.constant 0 : i32
    return %c0_i32, %c0_i32_0 : i32, i32
  }
  func.func @transform_6(%arg0: i32) -> (i32, i32) {
    %c0_i32 = arith.constant 0 : i32
    %c0_i32_0 = arith.constant 0 : i32
    %c0_i32_1 = arith.constant 0 : i32
    return %c0_i32, %c0_i32_0 : i32, i32
  }
  func.func @transform_7(%arg0: i32) -> (i32, i32) {
    %c0_i32 = arith.constant 0 : i32
    %c0_i32_0 = arith.constant 0 : i32
    %c0_i32_1 = arith.constant 0 : i32
    return %c0_i32, %c0_i32_0 : i32, i32
  }
  func.func @transform_8(%arg0: i32) -> (i32, i32) {
    %c0_i32 = arith.constant 0 : i32
    %c0_i32_0 = arith.constant 0 : i32
    %c0_i32_1 = arith.constant 0 : i32
    return %c0_i32, %c0_i32_0 : i32, i32
  }
  func.func @transform_9(%arg0: i32) -> (i32, i32) {
    %c0_i32 = arith.constant 0 : i32
    %c0_i32_0 = arith.constant 0 : i32
    return %arg0, %c0_i32 : i32, i32
  }
  func.func @transform_10(%arg0: i32) -> (i32, i32) {
    %c0_i32 = arith.constant 0 : i32
    %c0_i32_0 = arith.constant 0 : i32
    return %arg0, %c0_i32 : i32, i32
  }
}

</mosaic_0001>

<bundles_post_ra>
// kernel: tpu_custom_call.1
= control target key start
LH: loop header
LB: loop body
LE: loop exit
PB: predicated region body
PF: predicated region fallthrough
CT: control target
= control target key end

     0   :  { %16 = vsyncpa [#allocation3], 0  ;;  %s1176_s0 = inlined_call_operand.hbm [shape: f32[2,16], index: 0, kind: input, shape index: {}]   ;;  %s1177_s1 = inlined_call_operand.hbm [shape: f32[2,32], index: 1, kind: input, shape index: {}]   ;;  %s1178_s2 = inlined_call_operand.vmem [shape: f32[2,16], index: 2, kind: input, shape index: {}]   ;;  %s1179_s3 = inlined_call_operand.hbm [shape: f32[16,32], index: 3, kind: input, shape index: {}]   ;;  %s1180_s4 = inlined_call_operand.vmem [shape: f32[1,512], index: 4, kind: input, shape index: {}]   ;;  %s1181_s5 = inlined_call_operand.hbm [shape: f32[32,64], index: 5, kind: input, shape index: {}]   ;;  %s1182_s6 = inlined_call_operand.vmem [shape: f32[1,64], index: 6, kind: input, shape index: {}]   ;;  %s1183_s7 = inlined_call_operand.hbm [shape: f32[16,512], index: 7, kind: input, shape index: {}]   ;;  %s1184_s8 = inlined_call_operand.hbm [shape: f32[64,512], index: 8, kind: input, shape index: {}]   ;;  %s1185_s9 = inlined_call_operand.hbm [shape: f32[2,512], index: 9, kind: output, shape index: {0}]   ;;  %s1186_s10 = inlined_call_operand.hbm [shape: f32[2,32], index: 10, kind: output, shape index: {1}]  }
   0x1   :  { %17 = vsyncpa [#allocation6], 0 }
   0x2   :  { %18 = vsyncpa [#allocation9], 0 }
   0x3   :  { %19 = vsyncpa [#allocation12], 0 }
   0x4   :  { %20 = vsyncpa [#allocation4], 0 }
   0x5   :  { %21 = vsyncpa [#allocation15], 0  ;;  %s1036_s13 = smov [#allocation5]  }
   0x6   :  { %s38_s14 = sshll.u32 %s1036_s13, 4  ;;  %s39_s14 = int_to_ptr.vmem [resolvable:$true] %s38_s14 }
   0x7   :  { %s872_s15 = scalar_lea.vmem %s39_s14, 32  ;;  %p877_p1 = scmp.lt.s32.totalorder %s39_s14, %s39_s14 }
   0x8   :  { %p873_p0 = scmp.ne.s32.totalorder %s39_s14, %s872_s15  ;;  %p878_p2 = scmp.lt.s32.totalorder %s872_s15, %s872_s15 }
   0xa   :  { %p879_p3 = por %p878_p2, %p877_p1 }
   0xc   :  { %p880_p4 = pnand %p879_p3, %p873_p0 }
   0xe   :  { %883 = shalt.err (!%p880_p4)
}
   0xf   :  { %41 = dma.hbm_to_vmem [thread:$0]  %s1177_s1, 32, %s39_s14, [#allocation6]  }
  0x10   :  { %s1037_s18 = smov [#allocation8]   ;;  %s1038_s20 = smov [#allocation2]  }
  0x11   :  { %s63_s19 = sshll.u32 %s1037_s18, 4  ;;  %s28_s21 = sshll.u32 %s1038_s20, 4  ;;  %s64_s19 = int_to_ptr.vmem [resolvable:$true] %s63_s19  ;;  %s29_s21 = int_to_ptr.vmem [resolvable:$true] %s28_s21 }
  0x12   :  { %s892_s22 = scalar_lea.vmem %s64_s19, 512  ;;  %p897_p6 = scmp.lt.s32.totalorder %s64_s19, %s64_s19 }
  0x13   :  { %p893_p5 = scmp.ne.s32.totalorder %s64_s19, %s892_s22  ;;  %p898_p7 = scmp.lt.s32.totalorder %s892_s22, %s892_s22 }
  0x15   :  { %p899_p8 = por %p898_p7, %p897_p6 }
  0x17   :  { %p900_p9 = pnand %p899_p8, %p893_p5 }
  0x19   :  { %903 = shalt.err (!%p900_p9)
}
  0x1a   :  { %s1039_s23 = smov 128   ;;  %s1040_s24 = smov 8  }
  0x1b   :  { %69 = dma.hbm_to_vmem [thread:$0]  %s1181_s5, 512, %s64_s19, [#allocation9], %s1039_s23, %s1039_s23, %s1040_s24  }
  0x1c   :  { %s912_s1 = scalar_lea.vmem %s29_s21, 32  ;;  %p917_p11 = scmp.lt.s32.totalorder %s29_s21, %s29_s21 }
  0x1d   :  { %p913_p10 = scmp.ne.s32.totalorder %s29_s21, %s912_s1  ;;  %p918_p12 = scmp.lt.s32.totalorder %s912_s1, %s912_s1 }
  0x1f   :  { %p919_p13 = por %p918_p12, %p917_p11 }
  0x21   :  { %p920_p0 = pnand %p919_p13, %p913_p10 }
  0x23   :  { %923 = shalt.err (!%p920_p0)
}
  0x24   :  { %31 = dma.hbm_to_vmem [thread:$0]  %s1176_s0, 32, %s29_s21, [#allocation3]  }
  0x25   :  { %s1041_s29 = smov [#allocation7]   ;;  %s1042_s11 = smov [#allocation10]  }
  0x26   :  { %s49_s30 = sshll.u32 %s1041_s29, 4  ;;  %s77_s12 = sshll.u32 %s1042_s11, 4  ;;  %s50_s30 = int_to_ptr.vmem [resolvable:$true] %s49_s30  ;;  %s78_s12 = int_to_ptr.vmem [resolvable:$true] %s77_s12 }
  0x27   :  { %s932_s13 = scalar_lea.vmem %s50_s30, 256  ;;  %p937_p2 = scmp.lt.s32.totalorder %s50_s30, %s50_s30 }
  0x28   :  { %p933_p1 = scmp.ne.s32.totalorder %s50_s30, %s932_s13  ;;  %p938_p3 = scmp.lt.s32.totalorder %s932_s13, %s932_s13 }
  0x2a   :  { %p939_p4 = por %p938_p3, %p937_p2 }
  0x2c   :  { %p940_p5 = pnand %p939_p4, %p933_p1 }
  0x2e   :  { %943 = shalt.err (!%p940_p5)
}
  0x2f   :  { %55 = dma.hbm_to_vmem [thread:$0]  %s1179_s3, 256, %s50_s30, [#allocation6], %s1039_s23, %s1039_s23, %s1040_s24  }
  0x30   :  { %s952_s15 = scalar_lea.vmem %s78_s12, 1024  ;;  %p957_p7 = scmp.lt.s32.totalorder %s78_s12, %s78_s12 }
  0x31   :  { %p953_p6 = scmp.ne.s32.totalorder %s78_s12, %s952_s15  ;;  %p958_p8 = scmp.lt.s32.totalorder %s952_s15, %s952_s15 }
  0x33   :  { %p959_p9 = por %p958_p8, %p957_p7 }
  0x35   :  { %p960_p10 = pnand %p959_p9, %p953_p6 }
  0x37   :  { %963 = shalt.err (!%p960_p10)
}
  0x38   :  { %s1043_s0 = smov 512   ;;  %s1044_s16 = smov 32  }
  0x39   :  { %83 = dma.hbm_to_vmem [thread:$0]  %s1183_s7, 1024, %s78_s12, [#allocation9], %s1043_s0, %s1043_s0, %s1044_s16  }
  0x3a   :  { %s1045_s19 = smov [#allocation11]  }
  0x3b   :  { %s89_s20 = sshll.u32 %s1045_s19, 4  ;;  %s90_s20 = int_to_ptr.vmem [resolvable:$true] %s89_s20 }
  0x3c   :  { %s972_s21 = scalar_lea.vmem %s90_s20, 4096  ;;  %p977_p12 = scmp.lt.s32.totalorder %s90_s20, %s90_s20 }
  0x3d   :  { %p973_p11 = scmp.ne.s32.totalorder %s90_s20, %s972_s21  ;;  %p978_p13 = scmp.lt.s32.totalorder %s972_s21, %s972_s21 }
  0x3f   :  { %p979_p0 = por %p978_p13, %p977_p12 }
  0x41   :  { %p980_p1 = pnand %p979_p0, %p973_p11 }
  0x43   :  { %983 = shalt.err (!%p980_p1)
}
  0x44   :  { %95 = dma.hbm_to_vmem [thread:$0]  %s1184_s8, 4096, %s90_s20, [#allocation12], %s1043_s0, %s1043_s0, %s1044_s16  }
  0x45   :  { %1024 = dma.done.wait [#allocation3], 32  }
  0x46   :  { %1025 = vsyncadd [#allocation3], 4294967264 }
  0x47   :  { %1026 = dma.done.wait [#allocation6], 288  }
  0x48   :  { %1027 = vsyncadd [#allocation6], 4294967008 }
  0x49   :  { %1028 = dma.done.wait [#allocation9], 1536  }
  0x4a   :  { %1029 = vsyncadd [#allocation9], 4294965760 }
  0x4b   :  { %1030 = dma.done.wait [#allocation12], 4096  }
  0x4c   :  { %1031 = vsyncadd [#allocation12], 4294963200  ;;  %v1046_v0 = vmov 0.0   ;;  %vm1047_vm0 = vmmov 0   ;;  %v118_v1 = vld [vmem:[#allocation8 + $0x18] sm:$0xff]  ;;  %v117_v2 = vld [vmem:[#allocation8 + $0x10] sm:$0xff]  ;;  %v200_v54 = vlaneseq }
  0x4d   :  { %817 = vmatprep.subr.mxu0 %v1046_v0  ;;  %825 = vmatprep.mubr.msk.f32.mxu0 %vm1047_vm0, %v1046_v0  ;;  %v116_v3 = vld [vmem:[#allocation8 + $0x8] sm:$0xff]  ;;  %v115_v4 = vld [vmem:[#allocation8] sm:$0xff]  ;;  %vm126_vm1 = vcmask 261120   ;;  %vm220_vm2 = vcmask 130048   ;;  %v219_v11 = vld [vmem:[#allocation10 + $0x38] sm:$0xff]  ;;  %vm398_vm4 = vcmask 523264  }
  0x4e   :  { %288 = vmatprep.mubr.f32.mxu1 %v1046_v0  ;;  %818 = vmatpush3.msra.mxu0 %v118_v1  ;;  %v114_v5 = vld [vmem:[#allocation5] sm:$0x3]  ;;  %v216_v7 = vld [vmem:[#allocation10 + $0x20] sm:$0xff]  ;;  %v1135_v10 = vld [vmem:[#allocation2] sm:$0x3]  ;;  %v201_v55 = vand.u32 127, %v200_v54 }
  0x4f   :  { %819 = vmatprep.subr.mxu0 %v1046_v0  ;;  %v217_v6 = vld [vmem:[#allocation10 + $0x28] sm:$0xff]  ;;  %v212_v9 = vld [vmem:[#allocation10] sm:$0xff]  ;;  %v218_v12 = vld [vmem:[#allocation10 + $0x30] sm:$0xff]  ;;  %vm747_vm5 = vcmask 123904  }
  0x50   :  { %820 = vmatpush3.msra.mxu0 %v117_v2  ;;  %252 = vmatprep.subr.mxu1 %v217_v6  ;;  %v213_v8 = vld [vmem:[#allocation10 + $0x8] sm:$0xff]  ;;  %v215_v13 = vld [vmem:[#allocation10 + $0x18] sm:$0xff]  ;;  %v214_v14 = vld [vmem:[#allocation10 + $0x10] sm:$0xff]  ;;  %vm202_vm3 = vcmp.lt.s32.totalorder %v201_v55, 32  ;;  %v551_v2 = vshrl.u32 %v200_v54, 7 }
  0x51   :  { %821 = vmatprep.subr.mxu0 %v1046_v0  ;;  %253 = vmatpush1.msra.mxu1 %v216_v7  ;;  %v397_v15 = vld [vmem:[#allocation11 + $0xf8] sm:$0xff]  ;;  %v395_v16 = vld [vmem:[#allocation11 + $0xe8] sm:$0xff]  ;;  %v396_v17 = vld [vmem:[#allocation11 + $0xf0] sm:$0xff]  ;;  %v1048_v6 = vmov 1983009808  }
  0x52   :  { %822 = vmatpush3.msra.mxu0 %v116_v3  ;;  %254 = vmatprep.subr.mxu1 %v213_v8  ;;  %v394_v18 = vld [vmem:[#allocation11 + $0xe0] sm:$0xff]  ;;  %v393_v19 = vld [vmem:[#allocation11 + $0xd8] sm:$0xff]  ;;  %v391_v20 = vld [vmem:[#allocation11 + $0xc8] sm:$0xff]  ;;  %v581_v7 = vunpack.c.l.s4 %v1048_v6 }
  0x53   :  { %823 = vmatprep.subr.mxu0 %v1046_v0  ;;  %255 = vmatpush1.msra.mxu1 %v212_v9  ;;  %v392_v21 = vld [vmem:[#allocation11 + $0xd0] sm:$0xff]  ;;  %v390_v22 = vld [vmem:[#allocation11 + $0xc0] sm:$0xff]  ;;  %v389_v23 = vld [vmem:[#allocation11 + $0xb8] sm:$0xff]  ;;  %v556_v9 = vsub.s32 1, %v551_v2 }
  0x54   :  { %824 = vmatpush3.msra.mxu0 %v115_v4  ;;  %800 = vmatmul.mubr.msk.f32.vlgmr.msra.gmra.mxu1 %vm220_vm2, %v1135_v10  ;;  %v387_v24 = vld [vmem:[#allocation11 + $0xa8] sm:$0xff]  ;;  %v388_v25 = vld [vmem:[#allocation11 + $0xb0] sm:$0xff]  ;;  %v386_v26 = vld [vmem:[#allocation11 + $0xa0] sm:$0xff]  ;;  %v552_v4 = vsub.s32 0, %v551_v2 }
  0x55   :  { %826 = vmatmul.mubr.msk.f32.vlgmr.msra.gmra.mxu0 %vm126_vm1, %v114_v5  ;;  %323 = vmatprep.subr.mxu1 %v219_v11  ;;  %v385_v27 = vld [vmem:[#allocation11 + $0x98] sm:$0xff]  ;;  %v383_v28 = vld [vmem:[#allocation11 + $0x88] sm:$0xff]  ;;  %v384_v29 = vld [vmem:[#allocation11 + $0x90] sm:$0xff]  ;;  %v560_v5 = vsub.s32 2, %v551_v2 }
  0x56   :  { %466 = vmatprep.mubr.f32.mxu0 %v1046_v0  ;;  %324 = vmatpush1.msra.mxu1 %v218_v12  ;;  %v382_v30 = vld [vmem:[#allocation11 + $0x80] sm:$0xff]  ;;  %v381_v31 = vld [vmem:[#allocation11 + $0x78] sm:$0xff]  ;;  %v379_v32 = vld [vmem:[#allocation11 + $0x68] sm:$0xff] }
  0x57   :  { %359 = vmatprep.mubr.f32.mxu1 %v1046_v0  ;;  %325 = vmatprep.subr.mxu1 %v215_v13  ;;  %v380_v33 = vld [vmem:[#allocation11 + $0x70] sm:$0xff]  ;;  %v378_v34 = vld [vmem:[#allocation11 + $0x60] sm:$0xff]  ;;  %v377_v35 = vld [vmem:[#allocation11 + $0x58] sm:$0xff] }
  0x58   :  { %326 = vmatpush1.msra.mxu1 %v214_v14  ;;  %418 = vmatprep.subr.mxu0 %v395_v16  ;;  %v375_v36 = vld [vmem:[#allocation11 + $0x48] sm:$0xff]  ;;  %v376_v37 = vld [vmem:[#allocation11 + $0x50] sm:$0xff]  ;;  %v374_v38 = vld [vmem:[#allocation11 + $0x40] sm:$0xff] }
  0x59   :  { %801 = vmatmul.mubr.msk.f32.vlgmr.msra.gmra.mxu1 %vm220_vm2, %v1135_v10  ;;  %489 = vmatprep.subr.mxu1 %v397_v15  ;;  %v373_v39 = vld [vmem:[#allocation11 + $0x38] sm:$0xff]  ;;  %v371_v40 = vld [vmem:[#allocation11 + $0x28] sm:$0xff]  ;;  %v372_v41 = vld [vmem:[#allocation11 + $0x30] sm:$0xff]  ;;  %v582_v15 = vunpack.c.0.s8 %v581_v7 }
  0x5a   :  { %490 = vmatpush1.msra.mxu1 %v396_v17  ;;  %419 = vmatpush1.msra.mxu0 %v394_v18  ;;  %v370_v42 = vld [vmem:[#allocation11 + $0x20] sm:$0xff]  ;;  %v369_v43 = vld [vmem:[#allocation11 + $0x18] sm:$0xff]  ;;  %v367_v44 = vld [vmem:[#allocation11 + $0x8] sm:$0xff] }
  0x5b   :  { %491 = vmatprep.subr.mxu1 %v393_v19  ;;  %420 = vmatprep.subr.mxu0 %v391_v20  ;;  %v368_v45 = vld [vmem:[#allocation11 + $0x10] sm:$0xff]  ;;  %v366_v46 = vld [vmem:[#allocation11] sm:$0xff]  ;;  %v797_v47 = vld [vmem:[%s1182_s6] ss:$0 sm:$0xff] }
  0x5c   :  { %492 = vmatpush1.msra.mxu1 %v392_v21  ;;  %421 = vmatpush1.msra.mxu0 %v390_v22  ;;  %v597_v57 = vld [vmem:[%s1178_s2] sm:$0x3]  ;;  %v600_v59 = vld [vmem:[#allocation7 + $0x8] sm:$0xff]  ;;  %v599_v62 = vld [vmem:[#allocation7] sm:$0xff] }
  0x5d   :  { %493 = vmatprep.subr.mxu1 %v389_v23  ;;  %422 = vmatprep.subr.mxu0 %v387_v24  ;;  %v598_v61 = vmul.f32 %v597_v57, %v1135_v10  ;;  %v544_v8 = vld [vmem:[%s1180_s4] sm:$0xf]  ;;  %v564_v10 = vsub.s32 3, %v551_v2  ;;  %s1049_s4 = smov [#allocation13]  }
  0x5e   :  { %494 = vmatpush1.msra.mxu1 %v388_v25  ;;  %423 = vmatpush1.msra.mxu0 %v386_v26  ;;  %v553_v13 = vrot.slane %v544_v8, %v552_v4  ;;  %v561_v14 = vrot.slane %v544_v8, %v560_v5  ;;  %v557_v18 = vrot.slane %v544_v8, %v556_v9  ;;  %s771_s25 = sshll.u32 %s1049_s4, 4  ;;  %s772_s25 = int_to_ptr.vmem [resolvable:$true] %s771_s25 }
  0x5f   :  { %495 = vmatprep.subr.mxu1 %v385_v27  ;;  %424 = vmatprep.subr.mxu0 %v383_v28  ;;  %v565_v19 = vrot.slane %v544_v8, %v564_v10  ;;  %v585_v25 = vsub.s32 %v582_v15, %v551_v2  ;;  %s984_s26 = scalar_lea.vmem %s772_s25, 128  ;;  %p989_p3 = scmp.lt.s32.totalorder %s772_s25, %s772_s25 }
  0x60   :  { %496 = vmatpush1.msra.mxu1 %v384_v29  ;;  %425 = vmatpush1.msra.mxu0 %v382_v30  ;;  %p985_p2 = scmp.ne.s32.totalorder %s772_s25, %s984_s26  ;;  %p990_p4 = scmp.lt.s32.totalorder %s984_s26, %s984_s26 }
  0x61   :  { %497 = vmatprep.subr.mxu1 %v381_v31  ;;  %426 = vmatprep.subr.mxu0 %v379_v32 }
  0x62   :  { %498 = vmatpush1.msra.mxu1 %v380_v33  ;;  %427 = vmatpush1.msra.mxu0 %v378_v34  ;;  %p991_p5 = por %p990_p4, %p989_p3 }
  0x63   :  { %499 = vmatprep.subr.mxu1 %v377_v35  ;;  %428 = vmatprep.subr.mxu0 %v375_v36  ;;  %v748_v36 = vsel %vm747_vm5, %v598_v61, 0.0 }
  0x64   :  { %500 = vmatpush1.msra.mxu1 %v376_v37  ;;  %429 = vmatpush1.msra.mxu0 %v374_v38  ;;  %p992_p6 = pnand %p991_p5, %p985_p2 }
  0x65   :  { %501 = vmatprep.subr.mxu1 %v373_v39  ;;  %430 = vmatprep.subr.mxu0 %v371_v40 }
  0x66   :  { %502 = vmatpush1.msra.mxu1 %v372_v41  ;;  %431 = vmatpush1.msra.mxu0 %v370_v42 }
  0x67   :  { %503 = vmatprep.subr.mxu1 %v369_v43  ;;  %432 = vmatprep.subr.mxu0 %v367_v44 }
  0x68   :  { %504 = vmatpush1.msra.mxu1 %v368_v45  ;;  %433 = vmatpush1.msra.mxu0 %v366_v46 }
  0x69   :  { %537 = vmatprep.mubr.f32.mxu1 %v1046_v0  ;;  %835 = vmatprep.subr.mxu1 %v1046_v0 }
  0x6a   :  { %828 = vmatprep.subr.mxu0 %v1046_v0 }
 0x114   :  { %v290_v63 = vpop.f32.mrf.mxu1 }
 0x115   :  { %v196_v48 = vpop.f32.mrf.mxu0 }
 0x116   :  { %v197_v49 = vadd.f32 %v797_v47, %v196_v48  ;;  %v292_v1 = vpop.f32.mrf.mxu1 }
 0x117   :  { %v827_v50 = vpop.f32.mrf.mxu0 }
 0x118   :  { %v799_v51 = vmul.f32 -1.442695, %v197_v49 }
 0x119   :  { %v361_v3 = vpop.f32.mrf.mxu1 }
 0x11a   :  { %858 = vpow2.f32 %v799_v51 }
 0x11b   :  { %860 = vtanh.f32 %v197_v49  ;;  %v363_v11 = vpop.f32.mrf.mxu1 }
 0x127   :  { %v859_v52 = vpop.eup %858 }
 0x128   :  { %v207_v53 = vadd.f32 1.0, %v859_v52  ;;  %v861_v56 = vpop.eup %860 }
 0x12a   :  { %862 = vrcp.f32 %v207_v53 }
 0x137   :  { %v863_v58 = vpop.eup %862 }
 0x138   :  { %v1151_v60 = vsel %vm202_vm3, %v861_v56, %v863_v58 }
 0x139   :  { %802 = vmatmul.mubr.msk.f32.vlgmr.msra.gmra.mxu0 %vm398_vm4, %v1151_v60  ;;  %803 = vmatmul.mubr.msk.f32.vlgmr.msra.gmra.mxu1 %vm398_vm4, %v1151_v60 }
 0x13a   :  { %836 = vmatpush3.msra.mxu1 %v600_v59  ;;  %839 = vmatprep.mubr.msk.f32.mxu1 %vm1047_vm0, %v1046_v0 }
 0x13b   :  { %837 = vmatprep.subr.mxu1 %v1046_v0  ;;  %829 = vmatpush3.msra.mxu0 %v600_v59 }
 0x13c   :  { %838 = vmatpush3.msra.mxu1 %v599_v62  ;;  %830 = vmatprep.subr.mxu0 %v1046_v0 }
 0x13d   :  { %840 = vmatmul.mubr.msk.f32.vlgmr.msra.gmra.mxu1 %vm220_vm2, %v598_v61  ;;  %831 = vmatpush3.msra.mxu0 %v599_v62 }
 0x13e   :  { %832 = vmatprep.mubr.msk.f32.mxu0 %vm1047_vm0, %v1046_v0 }
 0x13f   :  { %833 = vmatmul.mubr.msk.f32.vlgmr.msra.gmra.mxu0 %vm220_vm2, %v597_v57 }
 0x1f9   :  { %v468_v12 = vpop.f32.mrf.mxu0  ;;  %v539_v0 = vpop.f32.mrf.mxu1 }
 0x1fa   :  { %v545_v16 = vmul.f32 %v468_v12, %v290_v63  ;;  %v547_v17 = vmul.f32 %v539_v0, %v361_v3 }
 0x1fb   :  { %v470_v20 = vpop.f32.mrf.mxu0  ;;  %v541_v21 = vpop.f32.mrf.mxu1 }
 0x1fc   :  { %v546_v22 = vmul.f32 %v470_v20, %v292_v1  ;;  %v548_v23 = vmul.f32 %v541_v21, %v363_v11  ;;  %v570_v26 = vadd.f32 %v553_v13, %v545_v16  ;;  %v572_v27 = vadd.f32 %v561_v14, %v547_v17 }
 0x1fd   :  { %v743_v24 = vpop.f32.mrf.mxu1 }
 0x1fe   :  { %v571_v28 = vadd.f32 %v557_v18, %v546_v22  ;;  %v573_v29 = vadd.f32 %v565_v19, %v548_v23  ;;  %752 = vrot.lane.b32.xlu0 %v743_v24, %s1044_s16 }
 0x1ff   :  { %v841_v30 = vpop.f32.mrf.mxu1  ;;  %v670_v37 = vpop.f32.mrf.mxu0 }
 0x200   :  { %v578_v31 = vcombine.low %v570_v26, %v571_v28  ;;  %v579_v32 = vcombine.low %v572_v27, %v573_v29 }
 0x201   :  { %v834_v38 = vpop.f32.mrf.mxu0 }
 0x202   :  { %v586_v33 = vrot.slane %v578_v31, %v585_v25  ;;  %v593_v34 = vrot.slane %v579_v32, %v585_v25 }
 0x204   :  { %v594_v35 = vcombine.low %v586_v33, %v593_v34 }
 0x206   :  { %596 = vst [vmem:[#allocation13] sm:$0xff] %v594_v35 }
 0x21d   :  { %749 = vadd.xlane.f32.xlu0 %v748_v36 }
 0x21e   :  { %995 = shalt.err (!%p992_p6)
}
 0x21f   :  { %774 = dma.vmem_to_hbm [thread:$0]  %s772_s25, 128, %s1185_s9, [#allocation4]   ;;  %vm763_vm6 = vcmask 254976  }
 0x220   :  { %s1050_s28 = smov 96   ;;  %s1051_s29 = smov [#allocation14]  }
 0x221   :  { %s781_s30 = sshll.u32 %s1051_s29, 4  ;;  %s782_s30 = int_to_ptr.vmem [resolvable:$true] %s781_s30 }
 0x222   :  { %s1004_s11 = scalar_lea.vmem %s782_s30, 32  ;;  %p1009_p8 = scmp.lt.s32.totalorder %s782_s30, %s782_s30 }
 0x223   :  { %p1005_p7 = scmp.ne.s32.totalorder %s782_s30, %s1004_s11  ;;  %p1010_p9 = scmp.lt.s32.totalorder %s1004_s11, %s1004_s11 }
 0x225   :  { %p1011_p10 = por %p1010_p9, %p1009_p8 }
 0x227   :  { %p1012_p11 = pnand %p1011_p10, %p1005_p7 }
 0x270   :  { %v753_v39 = vpop.permute.xlu0 %752 }
 0x271   :  { %v755_v40 = vmul.f32 %v753_v39, %v1151_v60 }
 0x273   :  { %757 = vrot.lane.b32.xlu1 %v755_v40, %s1050_s28 }
 0x2a6   :  { %v750_v41 = vpop.xlane.xlu0 %749 }
 0x2a7   :  { %v761_v43 = vmul.f32 %v750_v41, %v1151_v60 }
 0x2e5   :  { %v758_v42 = vpop.permute.xlu1 %757 }
 0x2e6   :  { %v760_v44 = vsub.f32 %v670_v37, %v758_v42 }
 0x2e8   :  { %v762_v45 = vadd.f32 %v761_v43, %v760_v44 }
 0x2ea   :  { %764 = vst.msk [vmem:[#allocation14] sm:$0x3] %vm763_vm6, %v762_v45 }
 0x2eb   :  { %1015 = shalt.err (!%p1012_p11)
}
 0x2ec   :  { %784 = dma.vmem_to_hbm [thread:$0]  %s782_s30, 32, %s1186_s10, [#allocation15]  }
 0x2ed   :  { %1032 = dma.done.wait [#allocation4], 128  }
 0x2ee   :  { %1033 = vsyncadd [#allocation4], 4294967168 }
 0x2ef   :  { %1034 = dma.done.wait [#allocation15], 32  }
 0x2f0   :  { %1035 = vsyncadd [#allocation15], 4294967264 }
 0x2f1   :  { %791 = vsyncpa [#allocation3], 1 }
 0x2f2   :  { %792 = vsyncpa [#allocation6], 1 }
 0x2f3   :  { %793 = vsyncpa [#allocation9], 1 }
 0x2f4   :  { %794 = vsyncpa [#allocation12], 1 }
 0x2f5   :  { %795 = vsyncpa [#allocation4], 1 }
 0x2f6   :  { %796 = vsyncpa [#allocation15], 1 }

</bundles_post_ra>
